<compile_context>
chip_gen: v5e
topology: v5e:2x2
jax: 0.10.0
libtpu: 0.0.40
codegen_flags: <defaults>
</compile_context>

<pallas_src>
import functools
import math

import jax
import jax.numpy as jnp
import numpy as np
from jax.experimental import pallas as pl
from jax.experimental.pallas import tpu as pltpu


def _label_smoothing_kernel(logp_ref, tgt_ref, part_ref, *, pad_val, B, V,
                            tb, tv, acc_rows, n_chunks, check_rows,
                            ragged_v, n_vt):
    i = pl.program_id(0)          # batch tile  ("parallel")
    j = pl.program_id(1)          # vocab tile  ("arbitrary" -> reduction)

    @pl.when(j == 0)
    def _():
        part_ref[...] = jnp.zeros_like(part_ref)

    def masked(chunk_f32, tgt_c, global_row0, col_ok):
        # Row validity: padding rows (target == ignore_index) contribute 0.
        valid = tgt_c != pad_val                                  # (rows, 1)
        if check_rows:                                            # ragged batch tail
            rows = (jax.lax.broadcasted_iota(jnp.int32,
                                             (chunk_f32.shape[0], 1), 0)
                    + global_row0)
            valid = jnp.logical_and(valid, rows < B)
        # NOTE: ragged-edge tiles may contain garbage (even NaN/Inf) in the
        # masked region; TPU select does NOT propagate the unselected branch,
        # so jnp.where is safe here.  Do not replace with multiply-by-mask
        # (0 * inf = NaN).
        out = jnp.where(valid, chunk_f32, 0.0)
        if col_ok is not None:                                    # ragged vocab tail
            out = jnp.where(col_ok, out, 0.0)
        return out

    def accumulate(col_ok):
        if n_chunks == 1:
            acc = masked(logp_ref[...].astype(jnp.float32), tgt_ref[...],
                         i * tb, col_ok)
        else:
            def body(r, a):
                # Chunked compute bounds live f32 intermediates to (acc_rows, tv).
                row0 = pl.multiple_of(r * acc_rows, acc_rows)
                c = logp_ref[pl.ds(row0, acc_rows), :].astype(jnp.float32)
                t = tgt_ref[pl.ds(row0, acc_rows), :]
                return a + masked(c, t, i * tb + r * acc_rows, col_ok)

            acc = jax.lax.fori_loop(
                0, n_chunks, body,
                jnp.zeros((acc_rows, tv), jnp.float32),
                unroll=True if n_chunks <= 8 else 8)
        part_ref[...] += acc[None]        # lane-dense resident accumulator

    if not ragged_v:
        accumulate(None)
    else:
        # Gate the (col < V) mask onto the last vocab tile only.
        @pl.when(j < n_vt - 1)
        def _():
            accumulate(None)

        @pl.when(j == n_vt - 1)
        def _():
            col = jax.lax.broadcasted_iota(jnp.int32, (1, tv), 1) + j * tv
            accumulate(col < V)


def _choose_tiles(B, V, itemsize, target_block_bytes):
    # ---- vocab (lane) tile: prefer full V or a multiple-of-128 divisor ----
    cap_v = 4096
    if V <= cap_v:
        tv = V
    else:
        tv = 0
        t = (cap_v // 128) * 128
        while t >= 128:
            if V % t == 0:
                tv = t
                break
            t -= 128
        if tv == 0:
            tv = cap_v                    # ragged last vocab tile (masked)
    # ---- batch (sublane) tile: multiple of 8 targeting ~target_block_bytes ----
    tb = target_block_bytes // max(1, tv * itemsize)
    tb = max(8, (tb // 8) * 8)
    # Keep >= 2 batch tiles when possible so the "parallel" axis can shard
    # across both v7x TensorCores (no-op on single-TC v5e/v6e).
    if B >= 16:
        half = -(-B // 2)
        half = -(-half // 8) * 8
        tb = min(tb, half)
    if tb >= B:
        tb = B                            # single (possibly ragged) batch tile
    elif B % tb != 0:
        # Prefer a tb that divides B (no ragged batch tail) when one exists.
        for t in range(tb, 7, -8):
            if B % t == 0:
                tb = t
                break
    return tb, tv


def label_smoothing_loss(output, target, norm, *, label_smoothing,
                         tgt_vocab_size, ignore_index=-100,
                         tb=None, tv=None, target_block_bytes=8 << 20,
                         buffer_count=None):
    """output: (B, V) log-probs (any float dtype), target: (B,) ints, norm: scalar."""
    assert 0.0 < label_smoothing <= 1.0
    B, V = output.shape
    assert V == tgt_vocab_size
    assert tgt_vocab_size > 2, "label smoothing requires tgt_vocab_size > 2"
    assert -tgt_vocab_size <= ignore_index < tgt_vocab_size, (
        "ignore_index must be a valid (possibly negative) column index, "
        "mirroring torch's one_hot[padding_idx] indexing")

    sv = float(label_smoothing) / float(tgt_vocab_size - 2)
    conf = 1.0 - float(label_smoothing)
    sv_logs = sv * math.log(sv) if sv > 0.0 else 0.0
    conf_logc = conf * math.log(conf) if conf > 0.0 else 0.0
    # Column zeroed by the buffer (torch negative indexing on one_hot).
    pad_col = ignore_index if ignore_index >= 0 else tgt_vocab_size + ignore_index
    pad_val = ignore_index               # raw value compared against `target`

    auto_tb, auto_tv = _choose_tiles(B, V, output.dtype.itemsize,
                                     target_block_bytes)
    tb = auto_tb if tb is None else tb
    tv = auto_tv if tv is None else tv
    assert tb <= B and tv <= V
    assert (tb % 8 == 0) or tb == B, "tb must be a multiple of 8 or equal B"
    assert (tv % 128 == 0) or tv == V, "tv must be a multiple of 128 or equal V"

    if tb % 8 != 0:
        acc_rows = tb
    else:
        # Keep chunk slices aligned to the dtype's sublane tiling (8 rows for
        # 32-bit, 16 for 16-bit) so dynamic-sliced loads need no relayout.
        sub_tile = 8 * max(1, 4 // output.dtype.itemsize)
        acc_rows = sub_tile if tb % sub_tile == 0 else 8
    n_chunks = tb // acc_rows
    n_bt = pl.cdiv(B, tb)
    n_vt = pl.cdiv(V, tv)

    kernel = functools.partial(
        _label_smoothing_kernel,
        pad_val=pad_val, B=B, V=V, tb=tb, tv=tv,
        acc_rows=acc_rows, n_chunks=n_chunks,
        check_rows=(B % tb != 0), ragged_v=(V % tv != 0), n_vt=n_vt,
    )

    tgt2d = target.astype(jnp.int32).reshape(B, 1)

    logp_spec_kwargs = {}
    if buffer_count is not None:          # optional pipeline-depth sweep knob
        logp_spec_kwargs["pipeline_mode"] = pl.Buffered(buffer_count)

    cost = pl.CostEstimate(
        flops=3 * B * V,
        transcendentals=0,
        bytes_accessed=(B * V * output.dtype.itemsize + B * 4
                        + n_bt * acc_rows * tv * 4))

    partials = pl.pallas_call(
        kernel,
        out_shape=jax.ShapeDtypeStruct((n_bt, acc_rows, tv), jnp.float32),
        grid_spec=pltpu.PrefetchScalarGridSpec(
            num_scalar_prefetch=0,
            grid=(n_bt, n_vt),
            in_specs=[
                pl.BlockSpec((tb, tv), lambda i, j: (i, j),
                             **logp_spec_kwargs),                 # log-prob tile
                pl.BlockSpec((tb, 1), lambda i, j: (i, 0)),       # target column
            ],
            out_specs=pl.BlockSpec((1, acc_rows, tv), lambda i, j: (i, 0, 0)),
        ),
        compiler_params=pltpu.CompilerParams(
            dimension_semantics=("parallel", "arbitrary"),
            vmem_limit_bytes=48 << 20,   # fits v5e/v6e (128 MiB) and v7x (64 MiB)
        ),
        cost_estimate=cost,
    )(output, tgt2d)

    # ---- O(B) constant-folded epilogue in plain JAX -------------------------
    # S = sum over valid rows of sum_j logp[i, j]
    s_total = jnp.sum(partials)

    valid = target != pad_val                                     # (B,)
    tgt_idx = jnp.clip(target, 0, V - 1).astype(jnp.int32)
    logp_t = jnp.take_along_axis(output, tgt_idx[:, None],
                                 axis=1)[:, 0].astype(jnp.float32)
    logp_pad = output[:, pad_col].astype(jnp.float32)

    # "Case B": the target column coincides with the zeroed pad column
    # (only possible when ignore_index wraps to a real column != pad_val).
    case_b = valid & (target == pad_col)
    case_a = valid & jnp.logical_not(case_b)

    n_valid = jnp.sum(valid.astype(jnp.float32))
    n_case_b = jnp.sum(case_b.astype(jnp.float32))
    sum_logp_t = jnp.sum(jnp.where(valid, logp_t, 0.0))
    sum_logp_pad = jnp.sum(jnp.where(case_a, logp_pad, 0.0))

    plogp_total = n_valid * (conf_logc + (V - 2) * sv_logs) + n_case_b * sv_logs
    loss = (plogp_total - sv * s_total
            - (conf - sv) * sum_logp_t + sv * sum_logp_pad)
    return loss / jnp.asarray(norm, dtype=jnp.float32)


def _reference(output, target, norm, *, label_smoothing, tgt_vocab_size,
               ignore_index):
    """Plain-JAX reference mirroring the PyTorch forward."""
    B, V = output.shape
    sv = label_smoothing / (tgt_vocab_size - 2)
    conf = 1.0 - label_smoothing
    pad_col = ignore_index if ignore_index >= 0 else tgt_vocab_size + ignore_index
    one_hot = jnp.full((V,), sv, jnp.float32).at[pad_col].set(0.0)
    p = jnp.tile(one_hot[None, :], (B, 1))
    p = p.at[jnp.arange(B), target].set(conf)
    p = jnp.where((target == ignore_index)[:, None], 0.0, p)
    out = output.astype(jnp.float32)
    term = jnp.where(p > 0.0, p * (jnp.log(p) - out), 0.0)
    return jnp.sum(term) / jnp.asarray(norm, jnp.float32)


if __name__ == "__main__":
    key = jax.random.PRNGKey(0)
    B, V = 20, 384                 # small, deliberately ragged batch
    label_smoothing = 0.1
    ignore_index = 0               # pad token id
    norm = 5.0

    k_logits, k_tgt = jax.random.split(key)
    logits = jax.random.normal(k_logits, (B, V), dtype=jnp.float32)
    output = jax.nn.log_softmax(logits, axis=-1)          # kl_div expects log-probs
    target = jax.random.randint(k_tgt, (B,), 0, V, dtype=jnp.int32)
    target = target.at[3].set(ignore_index)               # exercise padding-row mask
    target = target.at[17].set(ignore_index)

    ref = _reference(output, target, norm,
                     label_smoothing=label_smoothing,
                     tgt_vocab_size=V, ignore_index=ignore_index)

    # 1) Explicit tiles: ragged batch tail, multi-tile vocab, chunked fori_loop.
    loss1 = label_smoothing_loss(
        output, target, norm, label_smoothing=label_smoothing,
        tgt_vocab_size=V, ignore_index=ignore_index, tb=16, tv=128)
    loss1 = jax.block_until_ready(loss1)
    np.testing.assert_allclose(np.asarray(loss1), np.asarray(ref),
                               rtol=5e-5, atol=1e-3)

    # 2) Ragged vocab tail (384 % 256 != 0) -> pl.when-gated column mask,
    #    plus ragged batch tail.
    loss2 = label_smoothing_loss(
        output, target, norm, label_smoothing=label_smoothing,
        tgt_vocab_size=V, ignore_index=ignore_index, tb=8, tv=256)
    loss2 = jax.block_until_ready(loss2)
    np.testing.assert_allclose(np.asarray(loss2), np.asarray(ref),
                               rtol=5e-5, atol=1e-3)

    # 3) Auto-sized tiles (>=2 batch tiles, full-V vocab tile).
    loss3 = label_smoothing_loss(
        output, target, norm, label_smoothing=label_smoothing,
        tgt_vocab_size=V, ignore_index=ignore_index)
    loss3 = jax.block_until_ready(loss3)
    np.testing.assert_allclose(np.asarray(loss3), np.asarray(ref),
                               rtol=5e-5, atol=1e-3)

    # 4) bf16 input: DMA'd in native dtype, cast to f32 inside the kernel.
    output_bf16 = output.astype(jnp.bfloat16)
    ref_bf16 = _reference(output_bf16.astype(jnp.float32), target, norm,
                          label_smoothing=label_smoothing,
                          tgt_vocab_size=V, ignore_index=ignore_index)
    loss4 = label_smoothing_loss(
        output_bf16, target, norm, label_smoothing=label_smoothing,
        tgt_vocab_size=V, ignore_index=ignore_index, tb=16, tv=128)
    loss4 = jax.block_until_ready(loss4)
    np.testing.assert_allclose(np.asarray(loss4), np.asarray(ref_bf16),
                               rtol=1e-3, atol=1e-2)

    # 5) Negative ignore_index (wraps to column V-2; no padded rows; one row
    #    hits the "target == pad column" case, which scatter_ overrides).
    neg_ii = -2
    target_b = target.at[5].set(V + neg_ii)
    ref_neg = _reference(output, target_b, norm,
                         label_smoothing=label_smoothing,
                         tgt_vocab_size=V, ignore_index=neg_ii)
    loss5 = label_smoothing_loss(
        output, target_b, norm, label_smoothing=label_smoothing,
        tgt_vocab_size=V, ignore_index=neg_ii)
    loss5 = jax.block_until_ready(loss5)
    np.testing.assert_allclose(np.asarray(loss5), np.asarray(ref_neg),
                               rtol=5e-5, atol=1e-3)

    print("KERNEL_OK")
</pallas_src>

<mosaic_0001>
module attributes {stable_mosaic.version = 11 : i64} {
  func.func @_label_smoothing_kernel(%arg0: i32, %arg1: i32, %arg2: memref<16x128xf32, #tpu.memory_space<vmem>>, %arg3: memref<16x1xi32, #tpu.memory_space<vmem>>, %arg4: memref<1x8x128xf32, #tpu.memory_space<vmem>>) attributes {dimension_semantics = [#tpu.dimension_semantics<parallel>, #tpu.dimension_semantics<arbitrary>], iteration_bounds = array<i64: 2, 3>, scalar_prefetch = 0 : i64, scratch_operands = 0 : i64, tpu.core_type = #tpu.core_type<tc>, window_params = [{transform_indices = @transform_0, window_bounds = array<i64: 16, 128>}, {transform_indices = @transform_1, window_bounds = array<i64: 16, 1>}, {transform_indices = @transform_2, window_bounds = array<i64: 1, 8, 128>}]} {
    %c0_i32 = arith.constant 0 : i32
    %0 = arith.cmpi eq, %arg1, %c0_i32 : i32
    %1 = arith.extui %0 : i1 to i32
    %c0_i32_0 = arith.constant 0 : i32
    %2 = arith.cmpi ne, %1, %c0_i32_0 : i32
    scf.if %2 {
      %cst_20 = arith.constant 0.000000e+00 : f32
      %52 = vector.broadcast %cst_20 : f32 to vector<1x8x128xf32>
      %c0_21 = arith.constant 0 : index
      %c0_22 = arith.constant 0 : index
      %c0_23 = arith.constant 0 : index
      %53 = vector.load %arg4[%c0_21, %c0_22, %c0_23] : memref<1x8x128xf32, #tpu.memory_space<vmem>>, vector<1x8x128xf32>
      tpu.vector_store %arg4[%c0_21, %c0_22, %c0_23], %52 {strides = array<i32>} : memref<1x8x128xf32, #tpu.memory_space<vmem>>, vector<1x8x128xf32>,
    } else {
    }
    %cst = arith.constant 0.000000e+00 : f32
    %3 = vector.broadcast %cst : f32 to vector<8x128xf32>
    %c0_i32_1 = arith.constant 0 : i32
    %c8_i32 = arith.constant 8 : i32
    %4 = arith.muli %c0_i32_1, %c8_i32 : i32
    %5 = tpu.assume_multiple %4, 8 : i32
    %6 = arith.index_cast %5 : i32 to index
    %c0 = arith.constant 0 : index
    %7 = vector.load %arg2[%6, %c0] : memref<16x128xf32, #tpu.memory_space<vmem>>, vector<8x128xf32>
    %8 = arith.index_cast %5 : i32 to index
    %c0_2 = arith.constant 0 : index
    %9 = vector.load %arg3[%8, %c0_2] : memref<16x1xi32, #tpu.memory_space<vmem>>, vector<8x1xi32>
    %c16_i32 = arith.constant 16 : i32
    %10 = arith.muli %arg0, %c16_i32 : i32
    %c8_i32_3 = arith.constant 8 : i32
    %11 = arith.muli %c0_i32_1, %c8_i32_3 : i32
    %12 = arith.addi %10, %11 : i32
    %c0_i32_4 = arith.constant 0 : i32
    %13 = vector.broadcast %c0_i32_4 : i32 to vector<8x1xi32>
    %14 = arith.cmpi ne, %9, %13 : vector<8x1xi32>
    %15 = tpu.iota {dimensions = array<i32: 0>} : vector<8x1xi32>
    %16 = vector.broadcast %12 : i32 to vector<8x1xi32>
    %17 = arith.addi %15, %16 : vector<8x1xi32>
    %c20_i32 = arith.constant 20 : i32
    %18 = vector.broadcast %c20_i32 : i32 to vector<8x1xi32>
    %19 = arith.cmpi slt, %17, %18 : vector<8x1xi32>
    %20 = arith.andi %14, %19 : vector<8x1xi1>
    %cst_5 = arith.constant 0.000000e+00 : f32
    %21 = vector.shape_cast %20 : vector<8x1xi1> to vector<8x1xi1>
    %22 = vector.broadcast %21 : vector<8x1xi1> to vector<8x128xi1>
    %23 = vector.broadcast %cst_5 : f32 to vector<8x128xf32>
    %24 = arith.select %22, %7, %23 : vector<8x128xi1>, vector<8x128xf32>
    %25 = arith.addf %3, %24 : vector<8x128xf32>
    %c1_i32 = arith.constant 1 : i32
    %c8_i32_6 = arith.constant 8 : i32
    %26 = arith.muli %c1_i32, %c8_i32_6 : i32
    %27 = tpu.assume_multiple %26, 8 : i32
    %28 = arith.index_cast %27 : i32 to index
    %c0_7 = arith.constant 0 : index
    %29 = vector.load %arg2[%28, %c0_7] : memref<16x128xf32, #tpu.memory_space<vmem>>, vector<8x128xf32>
    %30 = arith.index_cast %27 : i32 to index
    %c0_8 = arith.constant 0 : index
    %31 = vector.load %arg3[%30, %c0_8] : memref<16x1xi32, #tpu.memory_space<vmem>>, vector<8x1xi32>
    %c16_i32_9 = arith.constant 16 : i32
    %32 = arith.muli %arg0, %c16_i32_9 : i32
    %c8_i32_10 = arith.constant 8 : i32
    %33 = arith.muli %c1_i32, %c8_i32_10 : i32
    %34 = arith.addi %32, %33 : i32
    %c0_i32_11 = arith.constant 0 : i32
    %35 = vector.broadcast %c0_i32_11 : i32 to vector<8x1xi32>
    %36 = arith.cmpi ne, %31, %35 : vector<8x1xi32>
    %37 = tpu.iota {dimensions = array<i32: 0>} : vector<8x1xi32>
    %38 = vector.broadcast %34 : i32 to vector<8x1xi32>
    %39 = arith.addi %37, %38 : vector<8x1xi32>
    %c20_i32_12 = arith.constant 20 : i32
    %40 = vector.broadcast %c20_i32_12 : i32 to vector<8x1xi32>
    %41 = arith.cmpi slt, %39, %40 : vector<8x1xi32>
    %42 = arith.andi %36, %41 : vector<8x1xi1>
    %cst_13 = arith.constant 0.000000e+00 : f32
    %43 = vector.shape_cast %42 : vector<8x1xi1> to vector<8x1xi1>
    %44 = vector.broadcast %43 : vector<8x1xi1> to vector<8x128xi1>
    %45 = vector.broadcast %cst_13 : f32 to vector<8x128xf32>
    %46 = arith.select %44, %29, %45 : vector<8x128xi1>, vector<8x128xf32>
    %47 = arith.addf %25, %46 : vector<8x128xf32>
    %c2_i32 = arith.constant 2 : i32
    %c0_14 = arith.constant 0 : index
    %c0_15 = arith.constant 0 : index
    %c0_16 = arith.constant 0 : index
    %48 = vector.load %arg4[%c0_14, %c0_15, %c0_16] : memref<1x8x128xf32, #tpu.memory_space<vmem>>, vector<1x8x128xf32>
    %49 = vector.shape_cast %47 : vector<8x128xf32> to vector<1x8x128xf32>
    %50 = arith.addf %48, %49 : vector<1x8x128xf32>
    %c0_17 = arith.constant 0 : index
    %c0_18 = arith.constant 0 : index
    %c0_19 = arith.constant 0 : index
    %51 = vector.load %arg4[%c0_17, %c0_18, %c0_19] : memref<1x8x128xf32, #tpu.memory_space<vmem>>, vector<1x8x128xf32>
    tpu.vector_store %arg4[%c0_17, %c0_18, %c0_19], %50 {strides = array<i32>} : memref<1x8x128xf32, #tpu.memory_space<vmem>>, vector<1x8x128xf32>,
    return
  }
  func.func @transform_0(%arg0: i32, %arg1: i32) -> (i32, i32) {
    %c0_i32 = arith.constant 0 : i32
    return %arg0, %arg1 : i32, i32
  }
  func.func @transform_1(%arg0: i32, %arg1: i32) -> (i32, i32) {
    %c0_i32 = arith.constant 0 : i32
    %c0_i32_0 = arith.constant 0 : i32
    return %arg0, %c0_i32 : i32, i32
  }
  func.func @transform_2(%arg0: i32, %arg1: i32) -> (i32, i32, i32) {
    %c0_i32 = arith.constant 0 : i32
    %c0_i32_0 = arith.constant 0 : i32
    %c0_i32_1 = arith.constant 0 : i32
    return %arg0, %c0_i32, %c0_i32_0 : i32, i32, i32
  }
}

</mosaic_0001>

<bundles_post_ra>
// kernel: tpu_custom_call.1
= control target key start
LH: loop header
LB: loop body
LE: loop exit
PB: predicated region body
PF: predicated region fallthrough
CT: control target
= control target key end

     0   :  { %7 = vsyncpa [#allocation3], 0  ;;  %s925_s0 = inlined_call_operand.hbm [shape: f32[20,384], index: 0, kind: input, shape index: {}]   ;;  %s926_s1 = inlined_call_operand.vmem [shape: s32[20,1], index: 1, kind: input, shape index: {}]   ;;  %s927_s2 = inlined_call_operand.hbm [shape: f32[2,8,128], index: 2, kind: output, shape index: {}]  }
   0x1   :  { %9 = vsyncpa [#allocation3 + $0x1], 0 }
   0x2   :  { %10 = vsyncpa [#allocation4], 0 }
   0x3   :  { %12 = vsyncpa [#allocation4 + $0x1], 0  ;;  %s699_s9 = smov 0   ;;  %s701_s10 = smov 0  }
   0x4   :  { %s703_s11 = smov 0   ;;  %s705_s12 = smov 0  }
   0x5   :  { %s707_s13 = smov 0   ;;  %s709_s14 = smov 0  }
   0x6   :  { %s711_s15 = smov 0   ;;  %s713_s16 = smov 0  }
   0x7   :  { %s715_s17 = smov 0   ;;  %s717_s18 = smov 0  }
   0x8   :  { %s719_s19 = smov 0  }
   0x9 LB: > { %932 = sst [smem:[#allocation8_spill]] %s656_s14  ;;  %s387_s20 = sadd.s32 4294967295, %s676_s19   ;;  %s676_s19 = sphi %s719_s19, %s18_s19   ;;  %s672_s18 = sphi %s717_s18, %s946_s18   ;;  %s668_s17 = sphi %s715_s17, %s953_s17   ;;  %s664_s16 = sphi %s713_s16, %s944_s16   ;;  %s660_s15 = sphi %s711_s15, %s952_s15   ;;  %s656_s14 = sphi %s709_s14, %s943_s14   ;;  %s652_s13 = sphi %s707_s13, %s951_s13   ;;  %s648_s12 = sphi %s705_s12, %s950_s12   ;;  %s644_s11 = sphi %s703_s11, %s949_s11   ;;  %s640_s10 = sphi %s701_s10, %s948_s10   ;;  %s636_s9 = sphi %s699_s9, %s947_s9  }
   0xa   : > { %933 = sst [smem:[#allocation9_spill]] %s672_s18  ;;  %s388_s21 = sadd.s32 4294967294, %s676_s19  }
   0xb   : > { %s27_s22 = sadd.s32 1, %s668_s17  ;;  %s30_s23 = sadd.s32 1, %s672_s18 }
   0xc   : > { %p28_p0 = scmp.ge.s32.totalorder %s27_s22, 3  ;;  %s39_s24 = sadd.s32 1, %s656_s14 }
   0xd   : > { %p46_p1 = scmp.ne.s32.totalorder %s656_s14, %s652_s13  ;;  %p47_p2 = scmp.eq.s32.totalorder %s676_s19, 0 }
   0xe   : > { %s955_s22 = smov (%p28_p0, %s27_s22), 0  ;;  %s957_s23 = smov (!%p28_p0, %s30_s23), %s672_s18 }
   0xf   : > { %934 = sst [smem:[#allocation10_spill]] %s955_s22  ;;  %s35_s25 = ssub.s32 %s668_s17, %s955_s22 }
  0x10   : > { %p765_p3 = por %p47_p2, %p46_p1  ;;  %p32_p4 = scmp.ge.s32.totalorder %s957_s23, 2 }
  0x11   : > { %p52_p5 = scmp.ne.s32.totalorder %s652_s13, %s648_s12  ;;  %p53_p6 = scmp.eq.s32.totalorder %s387_s20, 0 }
  0x12   : > { %s91_s27 = sadd.s32 1, %s644_s11  ;;  %s959_s23 = smov (%p32_p4, %s957_s23), 0 }
  0x13   : > { %936 = sst [smem:[#allocation11_spill]] %s959_s23  ;;  %p773_p7 = por %p53_p6, %p52_p5 }
  0x14   : > { %p101_p8 = scmp.ne.s32.totalorder %s644_s11, %s640_s10  ;;  %s34_s29 = ssub.s32 %s672_s18, %s959_s23 }
  0x15   : > { %p102_p9 = scmp.eq.s32.totalorder %s387_s20, 5  ;;  %s36_s30 = sor.u32 %s35_s25, %s34_s29 }
  0x16   : > { %p89_p10 = scmp.eq.s32.totalorder %s34_s29, 0  ;;  %p37_p11 = scmp.eq.s32.totalorder %s36_s30, 0 }
  0x17   : > { %p781_p12 = por %p102_p9, %p101_p8  ;;  %p107_p13 = scmp.ne.s32.totalorder %s640_s10, %s636_s9 }
  0x18   : > { %s786_s4 = scalar_select %p89_p10, %s644_s11, %s91_s27  }
  0x19   : > { %s789_s5 = scalar_select %p37_p11, %s656_s14, %s39_s24  }
  0x1a   : > { %p108_p0 = scmp.eq.s32.totalorder %s388_s21, 5  ;;  %p390_p2 = scmp.ge.s32.totalorder %s676_s19, 6 }
  0x1b   : > { %939 = sst [smem:[#allocation12_spill]] %s789_s5 }
  0x1c   : > { %p793_p1 = por %p108_p0, %p107_p13  ;;  %124 = sbr.rel (%p390_p2) target bundleno = 73 (0x49), region = 16 }
  0x21   : > { %127 = sbr.rel (!%p765_p3) target bundleno = 73 (0x49), region = 20  ;;  %s128_s7 = sand.u32 (%p765_p3), 1, %s656_s14  }
  0x22   : > { %s392_s8 = sshll.u32 (%p765_p3), %s672_s18, 1  ;;  %s391_s12 = sshll.u32 (%p765_p3), %s128_s7, 4 }
  0x23   : > { %s134_s20 = ssub.s32 (%p765_p3), 3, %s392_s8  ;;  %s805_s27 = scalar_lea.sflag (%p765_p3), [#allocation3], %s128_s7 }
  0x24   : > { %p135_p4 = scmp.lt.s32.totalorder (%p765_p3), %s134_s20, 2  ;;  %s132_s29 = scalar_lea.vmem (%p765_p3), [#allocation2], %s391_s12 }
  0x26   : > { %s961_s20 = smov (!%p135_p4, %s134_s20), 2 }
  0x27   : > { %s393_s21 = sshll.u32 %s961_s20, 3 }
  0x28   : > { %s138_s24 = ssub.s32 16, %s393_s21 }
  0x29   : > { %s139_s25 = sshll.u32 %s138_s24, 4 }
  0x2a   : > { %140 = vsyncadd %s805_s27, %s139_s25  ;;  %p808_p3 = scmp.ne.s32.totalorder %s393_s21, 0  ;;  %s412_s30 = smul.u32 6, %s672_s18 }
  0x2b   : > { %s813_s8 = sshll.u32 %s132_s29, 4  ;;  %s398_s23 = sshll.u32 %s961_s20, 7  ;;  %s150_s8 = int_to_ptr.vmem [resolvable:$true] %s813_s8 }
  0x2c   : > { %s143_s24 = sadd.s32 %s668_s17, %s412_s30  ;;  %s517_s14 = sshrl.u32 %s398_s23, 4 }
  0x2d   : > { %s396_s7 = sshll.u32 %s143_s24, 3  ;;  %s526_s24 = scalar_lea.hbm %s925_s0, 72 }
  0x2e   : > { %s145_s25 = scalar_lea.hbm %s925_s0, %s396_s7 }
  0x2f   : > { %s147_s5 = sshll.u32 %s145_s25, 4  ;;  %s821_s5 = int_to_ptr.hbm [resolvable:$true] %s147_s5 }
  0x30   : > { %s515_s21 = sshra.s32 %s821_s5, 4  ;;  %s516_s21 = int_to_ptr.hbm [resolvable:$true] %s515_s21 }
  0x31   : > { %s522_s18 = scalar_lea.hbm %s516_s21, %s517_s14 }
  0x32   : > { %p523_p5 = scmp.ne.s32.totalorder %s516_s21, %s522_s18  ;;  %p528_p9 = scmp.lt.s32.totalorder %s526_s24, %s522_s18 }
  0x34   : > { %p524_p6 = pnand %p523_p5, %p808_p3 }
  0x36   : > { %p525_p8 = pneg %p524_p6 }
  0x38   : > { %p530_p10 = pnand %p528_p9, %p525_p8 }
  0x3a   : > { %533 = shalt.err (!%p530_p10)
}
  0x3b   : > { %s534_s22 = sshra.s32 %s150_s8, 4  ;;  %s678_s12 = smov [#allocation2]   ;;  %s535_s22 = int_to_ptr.vmem [resolvable:$true] %s534_s22 }
  0x3c   : > { %s541_s7 = scalar_lea.vmem %s535_s22, %s517_s14  ;;  %s545_s25 = scalar_lea.vmem %s678_s12, 32 }
  0x3d   : > { %p542_p11 = scmp.ne.s32.totalorder %s535_s22, %s541_s7  ;;  %p547_p2 = scmp.lt.s32.totalorder %s545_s25, %s541_s7 }
  0x3f   : > { %p543_p13 = pnand %p542_p11, %p808_p3 }
  0x41   : > { %p544_p0 = pneg %p543_p13 }
  0x43   : > { %p549_p4 = pnand %p547_p2, %p544_p0 }
  0x45   : > { %552 = shalt.err (!%p549_p4)
}
  0x46   : > { %s679_s21 = smov 384   ;;  %s680_s18 = smov 128  }
  0x47   : > { %s681_s29 = smov 8  }
  0x48   : > { %155 = dma.hbm_to_vmem [thread:$0]  (%p808_p3), %s821_s5, %s398_s23, %s150_s8, %s805_s27, %s679_s21, %s680_s18, %s681_s29  }
  0x49 PF: > { %p399_p5 = scmp.ge.s32.totalorder %s676_s19, 1  ;;  %p174_p6 = scmp.lt.s32.totalorder %s676_s19, 7 }
  0x4b   : > { %p175_p8 = pnand %p399_p5, %p174_p6 }
  0x4c   : > { %s180_s14 = sand.u32 (!%p175_p8), 1, %s652_s13  }
  0x4d   : > { %178 = sbr.rel (%p175_p8) target bundleno = 235 (0xeb), region = 28  ;;  %s846_s30 = sshll.u32 (!%p175_p8), %s180_s14, 4 }
  0x4e   : > { %s181_s24 = scalar_lea.sflag (!%p175_p8), [#allocation3], %s180_s14  ;;  %s184_s22 = scalar_lea.vmem (!%p175_p8), [#allocation2], %s846_s30 }
  0x52   : > { %627 = dma.done.wait (%p773_p7), %s181_s24, 256  }
  0x53   : > { %629 = vsyncadd (%p773_p7), %s181_s24, 4294967040  ;;  %s212_s23 = sand.u32 1, %s640_s10   ;;  %s402_s5 = sshll.u32 %s664_s16, 1 }
  0x54   : > { %s401_s20 = sshll.u32 %s212_s23, 3  ;;  %p225_p3 = scmp.lt.s32.totalorder %s402_s5, 2 }
  0x55   : > { %s860_s12 = scalar_lea.vmem [#allocation5], %s401_s20  ;;  %p404_p9 = scmp.ne.s32.totalorder %s660_s15, 0 }
  0x56   : > { %s963_s5 = smov (!%p225_p3, %s402_s5), 2 }
  0x57   : > { %s403_s27 = sshll.u32 %s963_s5, 3  ;;  %237 = sbr.rel (%p404_p9) target bundleno = 94 (0x5e), region = 36 }
  0x58   : > { %s228_s7 = scalar_lea.vmem %s926_s1, %s403_s27 }
  0x5c   : > { %v682_v0 = vmov 0.0  }
  0x5d   : > { %238 = vst [vmem:[%s860_s12] sm:$0xff] %v682_v0 }
  0x5e PF: > { %s405_s28 = sshll.u32 %s664_s16, 4  ;;  %v243_v1 = vlaneseq  ;;  %v683_v2 = vmov 0   ;;  %v240_v3 = vld [vmem:[%s228_s7] sm:$0xff]  ;;  %v407_v9 = vld [vmem:[%s228_s7 + $0x8] sm:$0xff]  ;;  %s409_s15 = sshll.u32 %s664_s16, 3 }
  0x5f   : > { %514 = vset.pattern.permute.xlu0 %v683_v2  ;;  %v245_v4 = vstv %s405_s28  ;;  %s260_s25 = sadd.s32 8, %s405_s28  ;;  %vm242_vm0 = vcmp.ne.s32.totalorder %v240_v3, 0  ;;  %vm261_vm3 = vcmp.ne.s32.totalorder %v407_v9, 0  ;;  %v239_v13 = vld [vmem:[%s184_s22] sm:$0xff]  ;;  %v406_v14 = vld [vmem:[%s184_s22 + $0x8] sm:$0xff]  ;;  %s287_s29 = scalar_lea.hbm %s927_s2, %s409_s15 }
  0x60   : > { %v244_v5 = vshrl.u32 %v243_v1, 7  ;;  %v262_v6 = vstv %s260_s25  ;;  %s289_s14 = sshll.u32 %s860_s12, 4  ;;  %s291_s24 = sshll.u32 %s287_s29, 4  ;;  %s290_s14 = int_to_ptr.vmem [resolvable:$true] %s289_s14  ;;  %s292_s24 = int_to_ptr.hbm [resolvable:$true] %s291_s24 }
  0x61   : > { %s277_s16 = scalar_lea.sflag [#allocation4], %s212_s23  ;;  %s568_s30 = sshra.s32 %s292_s24, 4  ;;  %s569_s30 = int_to_ptr.hbm [resolvable:$true] %s568_s30 }
  0x62   : > { %v246_v7 = vadd.s32 %v245_v4, %v244_v5  ;;  %v263_v8 = vadd.s32 %v262_v6, %v244_v5  ;;  %s570_s22 = scalar_lea.hbm %s569_s30, 8  ;;  %s574_s27 = scalar_lea.hbm %s927_s2, 16 }
  0x63   : > { %p571_p7 = scmp.ne.s32.totalorder %s569_s30, %s570_s22  ;;  %p575_p13 = scmp.lt.s32.totalorder %s569_s30, %s927_s2 }
  0x64   : > { %vm247_vm1 = vcmp.lt.s32.totalorder %v246_v7, 20  ;;  %vm264_vm4 = vcmp.lt.s32.totalorder %v263_v8, 20  ;;  %v273_v17 = vld [vmem:[%s860_s12] sm:$0xff]  ;;  %p576_p0 = scmp.lt.s32.totalorder %s574_s27, %s570_s22 }
  0x65   : > { %vm248_vm2 = vmand %vm242_vm0, %vm247_vm1  ;;  %p572_p10 = pnand %p571_p7, %p781_p12 }
  0x66   : > { %v249_v10 = vsel %vm248_vm2, 1, %v683_v2  ;;  %vm265_vm5 = vmand %vm261_vm3, %vm264_vm4  ;;  %p577_p2 = por %p576_p0, %p575_p13 }
  0x67   : > { %251 = vperm.xlu0 %514, %v249_v10   ;;  %v266_v11 = vsel %vm265_vm5, 1, %v683_v2  ;;  %p573_p11 = pneg %p572_p10 }
  0x69   : > { %p578_p4 = pnand %p577_p2, %p573_p11 }
  0x6f   : > { %268 = vperm.xlu0 %514, %v266_v11  }
  0xd9   : > { %v252_v12 = vpop.permute.xlu0 %251 }
  0xda   : > { %vm253_vm6 = vcmp.eq.s32.totalorder %v252_v12, 1 }
  0xdb   : > { %v254_v16 = vsel %vm253_vm6, %v239_v13, 0.0 }
  0xe1   : > { %v269_v15 = vpop.permute.xlu0 %268 }
  0xe2   : > { %vm270_vm7 = vcmp.eq.s32.totalorder %v269_v15, 1 }
  0xe3   : > { %v271_v18 = vsel %vm270_vm7, %v406_v14, 0.0 }
  0xe4   : > { %v272_v19 = vadd.f32 %v271_v18, %v254_v16 }
  0xe6   : > { %v274_v20 = vadd.f32 %v273_v17, %v272_v19 }
  0xe8   : > { %275 = vst [vmem:[%s860_s12] sm:$0xff] %v274_v20 }
  0xe9   : > { %581 = shalt.err (!%p578_p4)
}
  0xea   : > { %414 = dma.vmem_to_hbm [thread:$0]  (%p781_p12), %s290_s14, 128, %s292_s24, %s277_s16  }
  0xeb PF: > { %p420_p5 = scmp.ge.s32.totalorder %s676_s19, 2  ;;  %s303_s23 = sand.u32 1, %s636_s9  }
  0xec   : > { %s304_s7 = scalar_lea.sflag [#allocation4], %s303_s23 }
  0xed   : > { %p417_p6 = pnand %p420_p5, %p793_p1 }
  0xef   : > { %p418_p8 = pneg %p417_p6 }
  0xf1   : > { %631 = dma.done.wait (%p418_p8), %s304_s7, 128  }
  0xf2   : > { %633 = vsyncadd (%p418_p8), %s304_s7, 4294967168  ;;  %s18_s19 = sadd.s32 1, %s676_s19   ;;  %s942_s3 = sld [smem:[#allocation8_spill]] }
  0xf3   : > { %p15_p3 = scmp.ge.s32.totalorder %s18_s19, 8   ;;  %s943_s14 = sld [smem:[#allocation12_spill]] }
  0xf4   : > { %s944_s16 = sld [smem:[#allocation9_spill]]  ;;  %s947_s9 = smov %s640_s10 }
  0xf5   : > { %s945_s28 = sld [smem:[#allocation10_spill]]  ;;  %s948_s10 = smov %s644_s11 }
  0xf6   : > { %s946_s18 = sld [smem:[#allocation11_spill]]  ;;  %s949_s11 = smov %s786_s4 }
  0xf7   : > { %s950_s12 = smov %s652_s13  ;;  %s952_s15 = smov %s668_s17 }
  0xf8   : > { %s951_s13 = smov %s942_s3  ;;  %17 = sbr.rel (!%p15_p3) target bundleno = 9 (0x9), region = 82 }
  0xfb   : > { %s953_s17 = smov %s945_s28 }
  0xfd   :  { %310 = vsyncpa [#allocation3], 1 }
  0xfe   :  { %312 = vsyncpa [#allocation3 + $0x1], 1 }
  0xff   :  { %313 = vsyncpa [#allocation4], 1 }
 0x100   :  { %315 = vsyncpa [#allocation4 + $0x1], 1 }

</bundles_post_ra>
